<compile_context>
chip_gen: v7x
topology: tpu7x:2x2x1
jax: 0.10.0
libtpu: 0.0.40
codegen_flags: <defaults>
</compile_context>

<pallas_src>
import math

import jax
import jax.numpy as jnp
from jax.experimental import pallas as pl
from jax.experimental.pallas import tpu as pltpu


def _round_up(x, m):
    return (x + m - 1) // m * m


def _head_kernel(feats_ref, w_ref, b_ref, out_ref):
    # feats_ref: [nt, HW, C] (input dtype)    w_ref: [NCpad, C] (bf16/f32)
    # b_ref:     [1, NCpad]  (f32)            out_ref: [nt, NCpad] (f32)
    nt, hw, c = feats_ref.shape

    # ---- Global average pool (sublane reduction, f32 accumulation) -------
    # Accumulate chunk-by-chunk so we never hold an f32 copy of the whole
    # feature tile (which would ~double per-step VMEM and spill).
    chunk = min(hw, 16)
    acc = jnp.zeros((nt, c), jnp.float32)
    for s0 in range(0, hw, chunk):
        cs = min(chunk, hw - s0)
        acc = acc + jnp.sum(
            feats_ref[:, s0:s0 + cs, :].astype(jnp.float32), axis=1)
    pooled = acc * (1.0 / hw)                                  # [nt, C] f32

    # ---- Linear classifier (MXU, f32 accumulation) -----------------------
    # Contract C with C directly; feed the MXU in the weight's dtype.
    logits = jax.lax.dot_general(
        pooled.astype(w_ref.dtype), w_ref[...],
        dimension_numbers=(((1,), (1,)), ((), ())),
        preferred_element_type=jnp.float32)                    # [nt, NCpad]
    out_ref[...] = logits + b_ref[...]


def _pick_batch_tile(n, hw, c, feat_itemsize, nc_pad, w_itemsize,
                     vmem_limit_bytes, min_grid_steps=4):
    """8-aligned batch tile from a VMEM budget.

    Accounts for: double-buffered feature stream, double-buffered f32 logits,
    single-buffered resident weight + bias, one f32 pooling chunk, headroom.
    Caps the tile so the grid has >= min_grid_steps steps (>= 2 per TC on
    v7x) and prefers tiles that divide the 8-rounded batch (no wasted rows).
    """
    n8 = _round_up(max(n, 1), 8)
    per_image = hw * c * feat_itemsize
    resident = nc_pad * c * w_itemsize + nc_pad * 4            # weight + bias
    chunk_rows = min(hw, 16)
    per_row = (2 * per_image                                   # feature DB
               + 2 * nc_pad * 4                                # f32 out DB
               + chunk_rows * c * 4)                           # f32 pool chunk
    headroom = 2 << 20
    avail = max(vmem_limit_bytes - resident - headroom, per_row * 8)
    nt_budget = max(8, (avail // per_row) // 8 * 8)
    nt_steps = max(8, (n8 // min_grid_steps) // 8 * 8)
    nt = min(nt_budget, nt_steps, n8)
    # Prefer the largest 8-multiple that divides the (8-rounded) batch, as
    # long as it is not much smaller than the budget/step-derived tile.
    for cand in range(nt, 7, -8):
        if n8 % cand == 0:
            if cand * 2 >= nt:
                nt = cand
            break
    return int(nt)


def image_classifier_head(feats_nhwc, weight, bias, *,
                          weight_dtype=jnp.bfloat16,
                          batch_tile=None,
                          vmem_limit_bytes=48 << 20):
    """Global-average-pool + linear-classifier head.

    feats_nhwc: [N, H, W, C] backbone feature map (TPU-native NHWC layout;
                emit NHWC from the backbone -- an NCHW->NHWC transpose outside
                the kernel costs a full extra HBM pass).
    weight:     [num_classes, C]     bias: [num_classes]
    Returns float32 logits [N, num_classes].

    vmem_limit_bytes defaults to 48 MiB: safely under v7x's 64 MiB/TC physical
    VMEM and comfortably above the 16/32 MiB scoped defaults on v5e/v6e
    (raise towards ~96 MiB on v5e/v6e for slightly larger tiles if desired).
    """
    n, h, w_sp, c = feats_nhwc.shape
    num_classes, c_w = weight.shape
    assert c_w == c, (c_w, c)
    hw = h * w_sp

    # [N, H, W, C] -> [N, HW, C]: contiguous-dim merge, no data movement.
    feats_flat = feats_nhwc.reshape(n, hw, c)

    # Pad classes to a multiple of 128 -> lane-dense (unmasked) stores and a
    # 128-aligned MXU output dimension; sliced off after the call.
    nc_pad = max(128, _round_up(num_classes, 128))
    w_pad = jnp.pad(weight, ((0, nc_pad - num_classes), (0, 0)))
    w_pad = w_pad.astype(weight_dtype)   # bf16 halves resident VMEM + DMA
    b_pad = jnp.pad(bias.astype(jnp.float32),
                    ((0, nc_pad - num_classes),)).reshape(1, nc_pad)

    if batch_tile is None:
        nt = _pick_batch_tile(n, hw, c, feats_flat.dtype.itemsize, nc_pad,
                              w_pad.dtype.itemsize, vmem_limit_bytes)
    else:
        nt = max(8, _round_up(int(batch_tile), 8))

    # Pad the batch so every block (incl. the last) is a full (8k, 128m)
    # block: unmasked stores, full sublane rows into the MXU.
    n_pad = _round_up(max(n, 1), nt)
    if n_pad != n:
        feats_flat = jnp.pad(feats_flat, ((0, n_pad - n), (0, 0), (0, 0)))

    grid = (n_pad // nt,)

    logits_pad = pl.pallas_call(
        _head_kernel,
        out_shape=jax.ShapeDtypeStruct((n_pad, nc_pad), jnp.float32),
        grid_spec=pltpu.PrefetchScalarGridSpec(
            num_scalar_prefetch=0,
            grid=grid,
            in_specs=[
                # Feature stream: auto double-buffered per batch tile.
                pl.BlockSpec((nt, hw, c), lambda i: (i, 0, 0)),
                # Classifier weight / bias: grid-invariant block index ->
                # single-buffered, VMEM-resident across all grid steps.
                pl.BlockSpec((nc_pad, c), lambda i: (0, 0),
                             pipeline_mode=pl.Buffered(1)),
                pl.BlockSpec((1, nc_pad), lambda i: (0, 0),
                             pipeline_mode=pl.Buffered(1)),
            ],
            out_specs=pl.BlockSpec((nt, nc_pad), lambda i: (i, 0)),
        ),
        compiler_params=pltpu.CompilerParams(
            # Batch tiles are independent -> shard across TensorCores.
            dimension_semantics=("parallel",),
            vmem_limit_bytes=int(vmem_limit_bytes),
        ),
    )(feats_flat, w_pad, b_pad)

    return logits_pad[:n, :num_classes]


def image_classifier_head_nchw(feats_nchw, weight, bias, **kwargs):
    """Compatibility wrapper for torch-style NCHW feature maps.

    Note: the transpose below is a full extra HBM read+write of the feature
    tensor; prefer emitting NHWC from the backbone and calling
    image_classifier_head directly.
    """
    return image_classifier_head(
        feats_nchw.transpose(0, 2, 3, 1), weight, bias, **kwargs)


def init_linear_params(key, feat_dim, num_classes):
    """Deterministic init matching torch.nn.Linear defaults (kaiming-uniform)."""
    kw, kb = jax.random.split(key)
    bound_w = math.sqrt(1.0 / feat_dim) * math.sqrt(3.0)
    weight = jax.random.uniform(kw, (num_classes, feat_dim),
                                minval=-bound_w, maxval=bound_w,
                                dtype=jnp.float32)
    bound_b = 1.0 / math.sqrt(feat_dim)
    bias = jax.random.uniform(kb, (num_classes,),
                              minval=-bound_b, maxval=bound_b,
                              dtype=jnp.float32)
    return weight, bias


if __name__ == "__main__":
    # Small synthetic stand-in for the resnet50 feature map (real model:
    # feat_dim=2048, H=W=7).  Backbone itself is not translated (see TODO).
    N, H, W, FEAT_DIM = 2, 8, 8, 32
    NUM_CLASSES = 16

    key = jax.random.PRNGKey(0)
    k_feats, k_params = jax.random.split(key)

    feats = jax.random.normal(k_feats, (N, H, W, FEAT_DIM), dtype=jnp.float32)
    weight, bias = init_linear_params(k_params, FEAT_DIM, NUM_CLASSES)

    logits = image_classifier_head(feats, weight, bias)
    logits = jax.block_until_ready(logits)
    assert logits.shape == (N, NUM_CLASSES)
    assert logits.dtype == jnp.float32

    # Reference with matching precision (bf16 weight / bf16 pooled, f32 acc).
    pooled_ref = feats.mean(axis=(1, 2))
    logits_ref = (jnp.dot(pooled_ref.astype(jnp.bfloat16),
                          weight.astype(jnp.bfloat16).T,
                          preferred_element_type=jnp.float32)
                  + bias.astype(jnp.float32))
    assert jnp.allclose(logits, logits_ref, atol=2e-3, rtol=2e-3), (
        float(jnp.max(jnp.abs(logits - logits_ref))))

    # Loose check against the full-f32 semantics of the PyTorch module.
    logits_f32 = pooled_ref @ weight.T + bias
    assert jnp.allclose(logits, logits_f32, atol=5e-2, rtol=5e-2)

    print("KERNEL_OK")
</pallas_src>

<mosaic_0001>
module attributes {stable_mosaic.version = 11 : i64} {
  func.func @_head_kernel(%arg0: i32, %arg1: memref<8x64x32xf32, #tpu.memory_space<vmem>>, %arg2: memref<128x32xbf16, #tpu.memory_space<vmem>>, %arg3: memref<1x128xf32, #tpu.memory_space<vmem>>, %arg4: memref<8x128xf32, #tpu.memory_space<vmem>>) attributes {dimension_semantics = [#tpu.dimension_semantics<parallel>], iteration_bounds = array<i64: 1>, scalar_prefetch = 0 : i64, scratch_operands = 0 : i64, tpu.core_type = #tpu.core_type<tc>, window_params = [{transform_indices = @transform_0, window_bounds = array<i64: 8, 64, 32>}, {pipeline_mode = #tpu.pipeline_mode<synchronous>, transform_indices = @transform_1, window_bounds = array<i64: 128, 32>}, {pipeline_mode = #tpu.pipeline_mode<synchronous>, transform_indices = @transform_2, window_bounds = array<i64: 1, 128>}, {transform_indices = @transform_3, window_bounds = array<i64: 8, 128>}]} {
    %cst = arith.constant 0.000000e+00 : f32
    %0 = vector.broadcast %cst : f32 to vector<8x32xf32>
    %c0 = arith.constant 0 : index
    %c0_0 = arith.constant 0 : index
    %c0_1 = arith.constant 0 : index
    %1 = vector.load %arg1[%c0, %c0_0, %c0_1] : memref<8x64x32xf32, #tpu.memory_space<vmem>>, vector<8x16x32xf32>
    %cst_2 = arith.constant dense<0.000000e+00> : vector<8x32xf32>
    %2 = vector.multi_reduction <add>, %1, %cst_2 [1] : vector<8x16x32xf32> to vector<8x32xf32>
    %3 = arith.addf %0, %2 : vector<8x32xf32>
    %c0_3 = arith.constant 0 : index
    %c16 = arith.constant 16 : index
    %c0_4 = arith.constant 0 : index
    %4 = vector.load %arg1[%c0_3, %c16, %c0_4] : memref<8x64x32xf32, #tpu.memory_space<vmem>>, vector<8x16x32xf32>
    %cst_5 = arith.constant dense<0.000000e+00> : vector<8x32xf32>
    %5 = vector.multi_reduction <add>, %4, %cst_5 [1] : vector<8x16x32xf32> to vector<8x32xf32>
    %6 = arith.addf %3, %5 : vector<8x32xf32>
    %c0_6 = arith.constant 0 : index
    %c32 = arith.constant 32 : index
    %c0_7 = arith.constant 0 : index
    %7 = vector.load %arg1[%c0_6, %c32, %c0_7] : memref<8x64x32xf32, #tpu.memory_space<vmem>>, vector<8x16x32xf32>
    %cst_8 = arith.constant dense<0.000000e+00> : vector<8x32xf32>
    %8 = vector.multi_reduction <add>, %7, %cst_8 [1] : vector<8x16x32xf32> to vector<8x32xf32>
    %9 = arith.addf %6, %8 : vector<8x32xf32>
    %c0_9 = arith.constant 0 : index
    %c48 = arith.constant 48 : index
    %c0_10 = arith.constant 0 : index
    %10 = vector.load %arg1[%c0_9, %c48, %c0_10] : memref<8x64x32xf32, #tpu.memory_space<vmem>>, vector<8x16x32xf32>
    %cst_11 = arith.constant dense<0.000000e+00> : vector<8x32xf32>
    %11 = vector.multi_reduction <add>, %10, %cst_11 [1] : vector<8x16x32xf32> to vector<8x32xf32>
    %12 = arith.addf %9, %11 : vector<8x32xf32>
    %cst_12 = arith.constant 1.562500e-02 : f32
    %13 = vector.broadcast %cst_12 : f32 to vector<8x32xf32>
    %14 = arith.mulf %12, %13 : vector<8x32xf32>
    %15 = arith.truncf %14 : vector<8x32xf32> to vector<8x32xbf16>
    %c0_13 = arith.constant 0 : index
    %c0_14 = arith.constant 0 : index
    %16 = vector.load %arg2[%c0_13, %c0_14] : memref<128x32xbf16, #tpu.memory_space<vmem>>, vector<128x32xbf16>
    %cst_15 = arith.constant dense<0.000000e+00> : vector<8x128xf32>
    %17 = tpu.matmul %15, %16, %cst_15 {dimension_numbers = #tpu.dot_dimension_numbers<[1], [1], [0], [0], [0, 0, 1, 0], [], []>} : vector<8x32xbf16>, vector<128x32xbf16>, vector<8x128xf32> -> vector<8x128xf32>
    %c0_16 = arith.constant 0 : index
    %c0_17 = arith.constant 0 : index
    %18 = vector.load %arg3[%c0_16, %c0_17] : memref<1x128xf32, #tpu.memory_space<vmem>>, vector<1x128xf32>
    %19 = vector.broadcast %18 : vector<1x128xf32> to vector<8x128xf32>
    %20 = arith.addf %17, %19 : vector<8x128xf32>
    %c0_18 = arith.constant 0 : index
    %c0_19 = arith.constant 0 : index
    %21 = vector.load %arg4[%c0_18, %c0_19] : memref<8x128xf32, #tpu.memory_space<vmem>>, vector<8x128xf32>
    tpu.vector_store %arg4[%c0_18, %c0_19], %20 {strides = array<i32>} : memref<8x128xf32, #tpu.memory_space<vmem>>, vector<8x128xf32>,
    return
  }
  func.func @transform_0(%arg0: i32) -> (i32, i32, i32) {
    %c0_i32 = arith.constant 0 : i32
    %c0_i32_0 = arith.constant 0 : i32
    %c0_i32_1 = arith.constant 0 : i32
    return %arg0, %c0_i32, %c0_i32_0 : i32, i32, i32
  }
  func.func @transform_1(%arg0: i32) -> (i32, i32) {
    %c0_i32 = arith.constant 0 : i32
    %c0_i32_0 = arith.constant 0 : i32
    %c0_i32_1 = arith.constant 0 : i32
    return %c0_i32, %c0_i32_0 : i32, i32
  }
  func.func @transform_2(%arg0: i32) -> (i32, i32) {
    %c0_i32 = arith.constant 0 : i32
    %c0_i32_0 = arith.constant 0 : i32
    %c0_i32_1 = arith.constant 0 : i32
    return %c0_i32, %c0_i32_0 : i32, i32
  }
  func.func @transform_3(%arg0: i32) -> (i32, i32) {
    %c0_i32 = arith.constant 0 : i32
    %c0_i32_0 = arith.constant 0 : i32
    return %arg0, %c0_i32 : i32, i32
  }
}

</mosaic_0001>

<bundles_post_ra>
// kernel: tpu_custom_call.1
= control target key start
LH: loop header
LB: loop body
LE: loop exit
PB: predicated region body
PF: predicated region fallthrough
CT: control target
= control target key end

     0   :  { %vm32_vm0 = vcmask 261120   ;;  %v667_v0 = vmov 0.0   ;;  %vm668_vm1 = vmmov 0   ;;  %s1101_s0 = inlined_call_operand.vmem [shape: f32[8,64,32], index: 0, kind: input, shape index: {}]   ;;  %s1102_s1 = inlined_call_operand.vmem [shape: bf16[128,32], index: 1, kind: input, shape index: {}]   ;;  %s1103_s2 = inlined_call_operand.vmem [shape: f32[1,128], index: 2, kind: input, shape index: {}]   ;;  %s1104_s3 = inlined_call_operand.hbm [shape: f32[8,128], index: 3, kind: output, shape index: {}]  }
   0x1   :  { %612 = vmatprep.subr.bf16.mxu0 %v667_v0  ;;  %v635_v1 = vld [vmem:[%s1102_s1] sm:$0xff]   ;;  %628 = vmatprep.mubr.msk.bf16.mxu0 %vm668_vm1, %v667_v0  ;;  %v636_v3 = vld [vmem:[%s1102_s1 + $0x8] sm:$0xff]   ;;  %v637_v4 = vld [vmem:[%s1102_s1 + $0x10] sm:$0xff]  }
   0x2   :  { %v515_v2 = vsel %vm32_vm0, %v635_v1, 0  ;;  %v638_v5 = vld [vmem:[%s1102_s1 + $0x18] sm:$0xff]   ;;  %v639_v6 = vld [vmem:[%s1102_s1 + $0x20] sm:$0xff]   ;;  %v518_v7 = vsel %vm32_vm0, %v636_v3, 0  ;;  %v711_v8 = vsel %vm32_vm0, %v637_v4, 0  ;;  %v17_v10 = vld [vmem:[%s1101_s0 + $0x8] sm:$0xff] }
   0x3   :  { %613 = vmatpush3.bf16.xpose.msra.mxu0 %v515_v2  ;;  %v16_v9 = vld [vmem:[%s1101_s0] sm:$0xff]  ;;  %v720_v11 = vsel %vm32_vm0, %v638_v5, 0  ;;  %v19_v13 = vld [vmem:[%s1101_s0 + $0x48] sm:$0xff]  ;;  %v34_v16 = vsel %vm32_vm0, %v17_v10, 0.0  ;;  %v734_v17 = vsel %vm32_vm0, %v639_v6, 0  ;;  %v641_v2 = vld [vmem:[%s1102_s1 + $0x30] sm:$0xff]  }
   0x4   :  { %614 = vmatprep.subr.bf16.mxu0 %v667_v0  ;;  %v18_v12 = vld [vmem:[%s1101_s0 + $0x40] sm:$0xff]  ;;  %v33_v15 = vsel %vm32_vm0, %v16_v9, 0.0  ;;  %v21_v18 = vld [vmem:[%s1101_s0 + $0x88] sm:$0xff]  ;;  %v43_v23 = vsel %vm32_vm0, %v19_v13, 0.0 }
   0x5   :  { %v20_v14 = vld [vmem:[%s1101_s0 + $0x80] sm:$0xff]  ;;  %v23_v20 = vld [vmem:[%s1101_s0 + $0xc8] sm:$0xff]  ;;  %v35_v21 = vadd.f32 %v34_v16, %v33_v15  ;;  %v42_v22 = vsel %vm32_vm0, %v18_v12, 0.0  ;;  %v52_v29 = vsel %vm32_vm0, %v21_v18, 0.0 }
   0x6   :  { %v22_v19 = vld [vmem:[%s1101_s0 + $0xc0] sm:$0xff]  ;;  %v25_v25 = vld [vmem:[%s1101_s0 + $0x108] sm:$0xff]  ;;  %v44_v27 = vadd.f32 %v43_v23, %v42_v22  ;;  %v51_v28 = vsel %vm32_vm0, %v20_v14, 0.0  ;;  %v61_v35 = vsel %vm32_vm0, %v23_v20, 0.0  ;;  %v114_v23 = vld [vmem:[%s1101_s0 + $0x18] sm:$0xff] }
   0x7   :  { %v24_v24 = vld [vmem:[%s1101_s0 + $0x100] sm:$0xff]  ;;  %v60_v30 = vsel %vm32_vm0, %v22_v19, 0.0  ;;  %v27_v31 = vld [vmem:[%s1101_s0 + $0x148] sm:$0xff]  ;;  %v36_v33 = vrot.slane %v35_v21, 4  ;;  %v53_v34 = vadd.f32 %v52_v29, %v51_v28  ;;  %v70_v40 = vsel %vm32_vm0, %v25_v25, 0.0  ;;  %v113_v19 = vld [vmem:[%s1101_s0 + $0x10] sm:$0xff] }
   0x8   :  { %v26_v26 = vld [vmem:[%s1101_s0 + $0x140] sm:$0xff]  ;;  %v69_v36 = vsel %vm32_vm0, %v24_v24, 0.0  ;;  %v29_v37 = vld [vmem:[%s1101_s0 + $0x188] sm:$0xff]  ;;  %v45_v38 = vrot.slane %v44_v27, 4  ;;  %v62_v39 = vadd.f32 %v61_v35, %v60_v30  ;;  %v79_v45 = vsel %vm32_vm0, %v27_v31, 0.0  ;;  %v115_v28 = vld [vmem:[%s1101_s0 + $0x50] sm:$0xff] }
   0x9   :  { %v28_v32 = vld [vmem:[%s1101_s0 + $0x180] sm:$0xff]  ;;  %v78_v41 = vsel %vm32_vm0, %v26_v26, 0.0  ;;  %v37_v42 = vadd.f32 %v36_v33, %v35_v21  ;;  %v54_v43 = vrot.slane %v53_v34, 4  ;;  %v71_v44 = vadd.f32 %v70_v40, %v69_v36  ;;  %v31_v55 = vld [vmem:[%s1101_s0 + $0x1c8] sm:$0xff]  ;;  %v117_v33 = vld [vmem:[%s1101_s0 + $0x90] sm:$0xff] }
   0xa   :  { %v30_v46 = vld [vmem:[%s1101_s0 + $0x1c0] sm:$0xff]  ;;  %v46_v47 = vadd.f32 %v45_v38, %v44_v27  ;;  %v63_v48 = vrot.slane %v62_v39, 4  ;;  %v80_v49 = vadd.f32 %v79_v45, %v78_v41  ;;  %v87_v50 = vsel %vm32_vm0, %v28_v32, 0.0  ;;  %v640_v60 = vld [vmem:[%s1102_s1 + $0x28] sm:$0xff]   ;;  %v116_v32 = vld [vmem:[%s1101_s0 + $0x58] sm:$0xff] }
   0xb   :  { %615 = vmatpush3.bf16.xpose.msra.mxu0 %v518_v7  ;;  %v38_v51 = vrot.slane %v37_v42, 2  ;;  %v55_v52 = vadd.f32 %v54_v43, %v53_v34  ;;  %v72_v53 = vrot.slane %v71_v44, 4  ;;  %v88_v54 = vsel %vm32_vm0, %v29_v37, 0.0  ;;  %v642_v7 = vld [vmem:[%s1102_s1 + $0x38] sm:$0xff]  }
   0xc   :  { %616 = vmatprep.subr.bf16.mxu0 %v667_v0  ;;  %v47_v56 = vrot.slane %v46_v47, 2  ;;  %v64_v57 = vadd.f32 %v63_v48, %v62_v39  ;;  %v81_v58 = vrot.slane %v80_v49, 4  ;;  %v89_v59 = vadd.f32 %v88_v54, %v87_v50  ;;  %v118_v38 = vld [vmem:[%s1101_s0 + $0x98] sm:$0xff] }
   0xd   :  { %v39_v61 = vadd.f32 %v38_v51, %v37_v42  ;;  %v56_v62 = vrot.slane %v55_v52, 2  ;;  %v73_v63 = vadd.f32 %v72_v53, %v71_v44  ;;  %v96_v1 = vsel %vm32_vm0, %v30_v46, 0.0  ;;  %v119_v42 = vld [vmem:[%s1101_s0 + $0xd0] sm:$0xff]  ;;  %v120_v43 = vld [vmem:[%s1101_s0 + $0xd8] sm:$0xff] }
   0xe   :  { %v48_v3 = vadd.f32 %v47_v56, %v46_v47  ;;  %v65_v4 = vrot.slane %v64_v57, 2  ;;  %v82_v5 = vadd.f32 %v81_v58, %v80_v49  ;;  %v90_v6 = vrot.slane %v89_v59, 4  ;;  %v121_v51 = vld [vmem:[%s1101_s0 + $0x110] sm:$0xff] }
   0xf   :  { %v40_v9 = vrot.slane %v39_v61, 1  ;;  %v57_v10 = vadd.f32 %v56_v62, %v55_v52  ;;  %v74_v12 = vrot.slane %v73_v63, 2  ;;  %v97_v13 = vsel %vm32_vm0, %v31_v55, 0.0  ;;  %v122_v52 = vld [vmem:[%s1101_s0 + $0x118] sm:$0xff]  ;;  %v125_v62 = vld [vmem:[%s1101_s0 + $0x190] sm:$0xff] }
  0x10   :  { %v49_v14 = vrot.slane %v48_v3, 1  ;;  %v66_v15 = vadd.f32 %v65_v4, %v64_v57  ;;  %v83_v16 = vrot.slane %v82_v5, 2  ;;  %v91_v18 = vadd.f32 %v90_v6, %v89_v59 }
  0x11   :  { %v58_v20 = vrot.slane %v57_v10, 1  ;;  %v75_v21 = vadd.f32 %v74_v12, %v73_v63  ;;  %v98_v22 = vadd.f32 %v97_v13, %v96_v1  ;;  %v805_v24 = vsel %vm32_vm0, %v641_v2, 0 }
  0x12   :  { %v67_v25 = vrot.slane %v66_v15, 1  ;;  %v84_v26 = vadd.f32 %v83_v16, %v82_v5  ;;  %v92_v27 = vrot.slane %v91_v18, 2  ;;  %v811_v29 = vsel %vm32_vm0, %v642_v7, 0 }
  0x13   :  { %617 = vmatpush3.bf16.xpose.msra.mxu0 %v711_v8  ;;  %v799_v8 = vsel %vm32_vm0, %v640_v60, 0  ;;  %v76_v30 = vrot.slane %v75_v21, 1  ;;  %v99_v31 = vrot.slane %v98_v22, 4  ;;  %v129_v34 = vsel %vm32_vm0, %v113_v19, 0.0 }
  0x14   :  { %618 = vmatprep.subr.bf16.mxu0 %v667_v0  ;;  %v820_v35 = vadd.f32 %v40_v9, %v39_v61  ;;  %v822_v36 = vadd.f32 %v49_v14, %v48_v3  ;;  %v85_v37 = vrot.slane %v84_v26, 1  ;;  %v130_v39 = vsel %vm32_vm0, %v114_v23, 0.0  ;;  %v124_v61 = vld [vmem:[%s1101_s0 + $0x158] sm:$0xff] }
  0x15   :  { %v828_v40 = vadd.f32 %v58_v20, %v57_v10  ;;  %v100_v41 = vadd.f32 %v99_v31, %v98_v22  ;;  %v131_v44 = vadd.f32 %v130_v39, %v129_v34  ;;  %v138_v45 = vsel %vm32_vm0, %v115_v28, 0.0 }
  0x16   :  { %v837_v46 = vadd.f32 %v67_v25, %v66_v15  ;;  %v839_v47 = vadd.f32 %v92_v27, %v91_v18  ;;  %v139_v48 = vsel %vm32_vm0, %v116_v32, 0.0  ;;  %v147_v49 = vsel %vm32_vm0, %v117_v33, 0.0 }
  0x17   :  { %v844_v50 = vadd.f32 %v76_v30, %v75_v21  ;;  %v132_v53 = vrot.slane %v131_v44, 4  ;;  %v140_v54 = vadd.f32 %v139_v48, %v138_v45  ;;  %v148_v55 = vsel %vm32_vm0, %v118_v38, 0.0 }
  0x18   :  { %v854_v56 = vadd.f32 %v85_v37, %v84_v26  ;;  %v149_v57 = vadd.f32 %v148_v55, %v147_v49  ;;  %v156_v58 = vsel %vm32_vm0, %v119_v42, 0.0  ;;  %v157_v59 = vsel %vm32_vm0, %v120_v43, 0.0 }
  0x19   :  { %v101_v60 = vrot.slane %v100_v41, 2  ;;  %v133_v63 = vadd.f32 %v132_v53, %v131_v44  ;;  %v141_v1 = vrot.slane %v140_v54, 4  ;;  %v158_v2 = vadd.f32 %v157_v59, %v156_v58 }
  0x1b   :  { %619 = vmatpush3.bf16.xpose.msra.mxu0 %v720_v11  ;;  %v123_v11 = vld [vmem:[%s1101_s0 + $0x150] sm:$0xff] }
  0x1c   :  { %620 = vmatprep.subr.bf16.mxu0 %v667_v0 }
  0x1d   :  { %8 = vsyncpa [#allocation3], 0  ;;  %v94_v3 = vrot.slane %v839_v47, 1  ;;  %v150_v4 = vrot.slane %v149_v57, 4  ;;  %v165_v5 = vsel %vm32_vm0, %v121_v51, 0.0  ;;  %v166_v6 = vsel %vm32_vm0, %v122_v52, 0.0 }
  0x1e   :  { %v126_v7 = vld [vmem:[%s1101_s0 + $0x198] sm:$0xff]  ;;  %v134_v9 = vrot.slane %v133_v63, 2  ;;  %v142_v10 = vadd.f32 %v141_v1, %v140_v54  ;;  %v159_v12 = vrot.slane %v158_v2, 4  ;;  %v174_v13 = vsel %vm32_vm0, %v123_v11, 0.0  ;;  %v127_v20 = vld [vmem:[%s1101_s0 + $0x1d0] sm:$0xff]  ;;  %v209_v11 = vld [vmem:[%s1101_s0 + $0x20] sm:$0xff] }
  0x1f   :  { %v151_v14 = vadd.f32 %v150_v4, %v149_v57  ;;  %v167_v15 = vadd.f32 %v166_v6, %v165_v5  ;;  %v175_v16 = vsel %vm32_vm0, %v124_v61, 0.0  ;;  %v183_v18 = vsel %vm32_vm0, %v125_v62, 0.0  ;;  %v128_v30 = vld [vmem:[%s1101_s0 + $0x1d8] sm:$0xff]  ;;  %v210_v61 = vld [vmem:[%s1101_s0 + $0x28] sm:$0xff]  ;;  %v211_v4 = vld [vmem:[%s1101_s0 + $0x60] sm:$0xff]  ;;  %s669_s18 = smov [#allocation2]  }
  0x20   :  { %v102_v19 = vadd.f32 %v101_v60, %v100_v41  ;;  %v135_v21 = vadd.f32 %v134_v9, %v133_v63  ;;  %v143_v22 = vrot.slane %v142_v10, 2  ;;  %v160_v23 = vadd.f32 %v159_v12, %v158_v2  ;;  %s585_s19 = sshll.u32 %s669_s18, 4  ;;  %s586_s19 = int_to_ptr.vmem [resolvable:$true] %s585_s19 }
  0x21   :  { %v152_v25 = vrot.slane %v151_v14, 2  ;;  %v168_v26 = vrot.slane %v167_v15, 4  ;;  %v176_v27 = vadd.f32 %v175_v16, %v174_v13  ;;  %v184_v28 = vsel %vm32_vm0, %v126_v7, 0.0  ;;  %v213_v7 = vld [vmem:[%s1101_s0 + $0xa0] sm:$0xff]  ;;  %s643_s20 = scalar_lea.vmem %s586_s19, 128  ;;  %p648_p1 = scmp.lt.s32.totalorder %s586_s19, %s586_s19 }
  0x22   :  { %v136_v31 = vrot.slane %v135_v21, 1  ;;  %v144_v32 = vadd.f32 %v143_v22, %v142_v10  ;;  %v161_v33 = vrot.slane %v160_v23, 2  ;;  %v185_v34 = vadd.f32 %v184_v28, %v183_v18  ;;  %v214_v18 = vld [vmem:[%s1101_s0 + $0xa8] sm:$0xff]  ;;  %p644_p0 = scmp.ne.s32.totalorder %s586_s19, %s643_s20  ;;  %p649_p2 = scmp.lt.s32.totalorder %s643_s20, %s643_s20 }
  0x23   :  { %621 = vmatpush3.bf16.xpose.msra.mxu0 %v734_v17  ;;  %v153_v37 = vadd.f32 %v152_v25, %v151_v14  ;;  %v169_v38 = vadd.f32 %v168_v26, %v167_v15  ;;  %v177_v39 = vrot.slane %v176_v27, 4  ;;  %v192_v41 = vsel %vm32_vm0, %v127_v20, 0.0  ;;  %v216_v26 = vld [vmem:[%s1101_s0 + $0xe8] sm:$0xff] }
  0x24   :  { %622 = vmatprep.subr.bf16.mxu0 %v667_v0  ;;  %v103_v42 = vrot.slane %v102_v19, 1  ;;  %v145_v43 = vrot.slane %v144_v32, 1  ;;  %v162_v44 = vadd.f32 %v161_v33, %v160_v23  ;;  %v186_v45 = vrot.slane %v185_v34, 4  ;;  %p650_p3 = por %p649_p2, %p648_p1 }
  0x25   :  { %v154_v17 = vrot.slane %v153_v37, 1  ;;  %v170_v48 = vrot.slane %v169_v38, 2  ;;  %v178_v49 = vadd.f32 %v177_v39, %v176_v27  ;;  %v193_v51 = vsel %vm32_vm0, %v128_v30, 0.0  ;;  %v217_v27 = vld [vmem:[%s1101_s0 + $0x120] sm:$0xff] }
  0x26   :  { %v137_v52 = vadd.f32 %v136_v31, %v135_v21  ;;  %v163_v53 = vrot.slane %v162_v44, 1  ;;  %v187_v54 = vadd.f32 %v186_v45, %v185_v34  ;;  %v194_v55 = vadd.f32 %v193_v51, %v192_v41  ;;  %p651_p4 = pnand %p650_p3, %p644_p0 }
  0x27   :  { %v891_v57 = vadd.f32 %v94_v3, %v839_v47  ;;  %v146_v58 = vadd.f32 %v145_v43, %v144_v32  ;;  %v171_v59 = vadd.f32 %v170_v48, %v169_v38  ;;  %v179_v60 = vrot.slane %v178_v49, 2  ;;  %v212_v3 = vld [vmem:[%s1101_s0 + $0x68] sm:$0xff] }
  0x28   :  { %v896_v62 = vadd.f32 %v103_v42, %v102_v19  ;;  %v155_v63 = vadd.f32 %v154_v17, %v153_v37  ;;  %v188_v1 = vrot.slane %v187_v54, 2  ;;  %v195_v2 = vrot.slane %v194_v55, 4  ;;  %v219_v37 = vld [vmem:[%s1101_s0 + $0x160] sm:$0xff]  ;;  %v220_v38 = vld [vmem:[%s1101_s0 + $0x168] sm:$0xff] }
  0x29   :  { %v164_v5 = vadd.f32 %v163_v53, %v162_v44  ;;  %v172_v6 = vrot.slane %v171_v59, 1  ;;  %v180_v47 = vadd.f32 %v179_v60, %v178_v49  ;;  %v225_v9 = vsel %vm32_vm0, %v209_v11, 0.0 }
  0x2a   :  { %v189_v10 = vadd.f32 %v188_v1, %v187_v54  ;;  %v196_v12 = vadd.f32 %v195_v2, %v194_v55  ;;  %v910_v13 = vadd.f32 %v137_v52, %v820_v35  ;;  %v226_v14 = vsel %vm32_vm0, %v210_v61, 0.0  ;;  %v221_v54 = vld [vmem:[%s1101_s0 + $0x1a0] sm:$0xff] }
  0x2b   :  { %623 = vmatpush3.bf16.xpose.msra.mxu0 %v799_v8  ;;  %v181_v15 = vrot.slane %v180_v47, 1  ;;  %v915_v16 = vadd.f32 %v146_v58, %v822_v36  ;;  %v215_v8 = vld [vmem:[%s1101_s0 + $0xe0] sm:$0xff]  ;;  %v227_v19 = vadd.f32 %v226_v14, %v225_v9  ;;  %v234_v35 = vsel %vm32_vm0, %v211_v4, 0.0  ;;  %v222_v58 = vld [vmem:[%s1101_s0 + $0x1a8] sm:$0xff] }
  0x2c   :  { %624 = vmatprep.subr.bf16.mxu0 %v667_v0  ;;  %v173_v20 = vadd.f32 %v172_v6, %v171_v59  ;;  %v197_v21 = vrot.slane %v196_v12, 2  ;;  %v235_v22 = vsel %vm32_vm0, %v212_v3, 0.0  ;;  %v243_v23 = vsel %vm32_vm0, %v213_v7, 0.0 }
  0x2d   :  { %v927_v36 = vadd.f32 %v155_v63, %v828_v40  ;;  %v930_v25 = vadd.f32 %v164_v5, %v837_v46  ;;  %v228_v28 = vrot.slane %v227_v19, 4  ;;  %v236_v30 = vadd.f32 %v235_v22, %v234_v35  ;;  %v218_v46 = vld [vmem:[%s1101_s0 + $0x128] sm:$0xff] }
  0x2e   :  { %v190_v31 = vrot.slane %v189_v10, 1  ;;  %v198_v32 = vadd.f32 %v197_v21, %v196_v12  ;;  %v244_v33 = vsel %vm32_vm0, %v214_v18, 0.0  ;;  %v252_v40 = vsel %vm32_vm0, %v215_v8, 0.0 }
  0x2f   :  { %v182_v34 = vadd.f32 %v181_v15, %v180_v47  ;;  %v229_v39 = vadd.f32 %v228_v28, %v227_v19  ;;  %v237_v41 = vrot.slane %v236_v30, 4  ;;  %v245_v42 = vadd.f32 %v244_v33, %v243_v23  ;;  %v305_v28 = vld [vmem:[%s1101_s0 + $0x30] sm:$0xff] }
  0x30   :  { %v199_v43 = vrot.slane %v198_v32, 1  ;;  %v950_v44 = vadd.f32 %v173_v20, %v844_v50  ;;  %v253_v45 = vsel %vm32_vm0, %v216_v26, 0.0  ;;  %v261_v17 = vsel %vm32_vm0, %v217_v27, 0.0 }
  0x31   :  { %v230_v48 = vrot.slane %v229_v39, 2  ;;  %v238_v49 = vadd.f32 %v237_v41, %v236_v30  ;;  %v246_v51 = vrot.slane %v245_v42, 4  ;;  %v254_v52 = vadd.f32 %v253_v45, %v252_v40 }
  0x32   :  { %v191_v53 = vadd.f32 %v190_v31, %v189_v10  ;;  %v262_v55 = vsel %vm32_vm0, %v218_v46, 0.0  ;;  %v270_v50 = vsel %vm32_vm0, %v219_v37, 0.0  ;;  %v271_v11 = vsel %vm32_vm0, %v220_v38, 0.0 }
  0x33   :  { %625 = vmatpush3.bf16.xpose.msra.mxu0 %v805_v24  ;;  %v223_v24 = vld [vmem:[%s1101_s0 + $0x1e0] sm:$0xff]  ;;  %v231_v59 = vadd.f32 %v230_v48, %v229_v39  ;;  %v239_v60 = vrot.slane %v238_v49, 2  ;;  %v247_v61 = vadd.f32 %v246_v51, %v245_v42  ;;  %v255_v63 = vrot.slane %v254_v52, 4 }
  0x34   :  { %626 = vmatprep.subr.bf16.mxu0 %v667_v0  ;;  %v200_v1 = vadd.f32 %v199_v43, %v198_v32  ;;  %v969_v2 = vadd.f32 %v182_v34, %v854_v56  ;;  %v263_v4 = vadd.f32 %v262_v55, %v261_v17  ;;  %v272_v5 = vadd.f32 %v271_v11, %v270_v50  ;;  %v224_v0 = vld [vmem:[%s1101_s0 + $0x1e8] sm:$0xff] }
  0x35   :  { %v240_v6 = vadd.f32 %v239_v60, %v238_v49  ;;  %v248_v47 = vrot.slane %v247_v61, 2  ;;  %v256_v3 = vadd.f32 %v255_v63, %v254_v52  ;;  %v279_v7 = vsel %vm32_vm0, %v221_v54, 0.0  ;;  %v310_v54 = vld [vmem:[%s1101_s0 + $0xb8] sm:$0xff]  ;;  %v311_v63 = vld [vmem:[%s1101_s0 + $0xf0] sm:$0xff] }
  0x36   :  { %v264_v9 = vrot.slane %v263_v4, 4  ;;  %v273_v10 = vrot.slane %v272_v5, 4  ;;  %v280_v12 = vsel %vm32_vm0, %v222_v58, 0.0  ;;  %v288_v14 = vsel %vm32_vm0, %v223_v24, 0.0 }
  0x37   :  { %v232_v15 = vrot.slane %v231_v59, 1  ;;  %v241_v56 = vrot.slane %v240_v6, 1  ;;  %v249_v18 = vadd.f32 %v248_v47, %v247_v61  ;;  %v257_v8 = vrot.slane %v256_v3, 2 }
  0x38   :  { %v265_v19 = vadd.f32 %v264_v9, %v263_v4  ;;  %v274_v35 = vadd.f32 %v273_v10, %v272_v5  ;;  %v281_v20 = vadd.f32 %v280_v12, %v279_v7  ;;  %v289_v21 = vsel %vm32_vm0, %v224_v0, 0.0  ;;  %v314_v12 = vld [vmem:[%s1101_s0 + $0x138] sm:$0xff] }
  0x39   :  { %v979_v22 = vadd.f32 %v191_v53, %v891_v57  ;;  %v250_v23 = vrot.slane %v249_v18, 1  ;;  %v258_v26 = vadd.f32 %v257_v8, %v256_v3  ;;  %v290_v27 = vadd.f32 %v289_v21, %v288_v14  ;;  %v306_v57 = vld [vmem:[%s1101_s0 + $0x38] sm:$0xff]  ;;  %v309_v53 = vld [vmem:[%s1101_s0 + $0xb0] sm:$0xff] }
  0x3a   :  { %v986_v30 = vadd.f32 %v200_v1, %v896_v62  ;;  %v266_v31 = vrot.slane %v265_v19, 2  ;;  %v275_v32 = vrot.slane %v274_v35, 2  ;;  %v282_v33 = vrot.slane %v281_v20, 4  ;;  %v308_v62 = vld [vmem:[%s1101_s0 + $0x78] sm:$0xff]  ;;  %v315_v14 = vld [vmem:[%s1101_s0 + $0x170] sm:$0xff] }
  0x3b   :  { %627 = vmatpush3.bf16.xpose.msra.mxu0 %v811_v29  ;;  %v233_v40 = vadd.f32 %v232_v15, %v231_v59  ;;  %v242_v34 = vadd.f32 %v241_v56, %v240_v6  ;;  %v259_v46 = vrot.slane %v258_v26, 1  ;;  %v291_v37 = vrot.slane %v290_v27, 4  ;;  %v307_v29 = vld [vmem:[%s1101_s0 + $0x70] sm:$0xff] }
  0x3c   :  { %v267_v38 = vadd.f32 %v266_v31, %v265_v19  ;;  %v276_v39 = vadd.f32 %v275_v32, %v274_v35  ;;  %v283_v41 = vadd.f32 %v282_v33, %v281_v20  ;;  %v321_v42 = vsel %vm32_vm0, %v305_v28, 0.0  ;;  %v316_v35 = vld [vmem:[%s1101_s0 + $0x178] sm:$0xff]  ;;  %v317_v20 = vld [vmem:[%s1101_s0 + $0x1b0] sm:$0xff] }
  0x3d   :  { %v251_v43 = vadd.f32 %v250_v23, %v249_v18  ;;  %v260_v45 = vadd.f32 %v259_v46, %v258_v26  ;;  %v292_v17 = vadd.f32 %v291_v37, %v290_v27  ;;  %v322_v48 = vsel %vm32_vm0, %v306_v57, 0.0  ;;  %v318_v33 = vld [vmem:[%s1101_s0 + $0x1b8] sm:$0xff]  ;;  %v319_v57 = vld [vmem:[%s1101_s0 + $0x1f0] sm:$0xff] }
  0x3e   :  { %v268_v49 = vrot.slane %v267_v38, 1  ;;  %v277_v51 = vrot.slane %v276_v39, 1  ;;  %v284_v52 = vrot.slane %v283_v41, 2  ;;  %v323_v55 = vadd.f32 %v322_v48, %v321_v42 }
  0x3f   :  { %v293_v50 = vrot.slane %v292_v17, 2  ;;  %v1006_v11 = vadd.f32 %v233_v40, %v910_v13  ;;  %v330_v58 = vsel %vm32_vm0, %v307_v29, 0.0  ;;  %v331_v24 = vsel %vm32_vm0, %v308_v62, 0.0  ;;  %v312_v13 = vld [vmem:[%s1101_s0 + $0xf8] sm:$0xff] }
  0x40   :  { %v269_v59 = vadd.f32 %v268_v49, %v267_v38  ;;  %v278_v60 = vadd.f32 %v277_v51, %v276_v39  ;;  %v285_v61 = vadd.f32 %v284_v52, %v283_v41  ;;  %v324_v1 = vrot.slane %v323_v55, 4  ;;  %v320_v29 = vld [vmem:[%s1101_s0 + $0x1f8] sm:$0xff] }
  0x41   :  { %v1014_v4 = vadd.f32 %v242_v34, %v915_v16  ;;  %v332_v5 = vadd.f32 %v331_v24, %v330_v58  ;;  %v339_v0 = vsel %vm32_vm0, %v309_v53, 0.0  ;;  %v340_v6 = vsel %vm32_vm0, %v310_v54, 0.0  ;;  %v313_v16 = vld [vmem:[%s1101_s0 + $0x130] sm:$0xff] }
  0x42   :  { %v1021_v47 = vadd.f32 %v293_v50, %v292_v17  ;;  %v1024_v3 = vadd.f32 %v251_v43, %v927_v36  ;;  %v1027_v7 = vadd.f32 %v260_v45, %v930_v25  ;;  %v325_v9 = vadd.f32 %v324_v1, %v323_v55 }
  0x43   :  { %v286_v10 = vrot.slane %v285_v61, 1  ;;  %v333_v15 = vrot.slane %v332_v5, 4  ;;  %v341_v36 = vadd.f32 %v340_v6, %v339_v0  ;;  %v348_v56 = vsel %vm32_vm0, %v311_v63, 0.0 }
  0x44   :  { %v1040_v25 = vadd.f32 %v269_v59, %v950_v44  ;;  %v1043_v18 = vadd.f32 %v278_v60, %v969_v2  ;;  %v326_v8 = vrot.slane %v325_v9, 2  ;;  %v349_v19 = vsel %vm32_vm0, %v312_v13, 0.0 }
  0x45   :  { %v334_v21 = vadd.f32 %v333_v15, %v332_v5  ;;  %v342_v23 = vrot.slane %v341_v36, 4  ;;  %v350_v26 = vadd.f32 %v349_v19, %v348_v56  ;;  %v357_v44 = vsel %vm32_vm0, %v313_v16, 0.0 }
  0x46   :  { %v295_v27 = vrot.slane %v1021_v47, 1  ;;  %v327_v2 = vadd.f32 %v326_v8, %v325_v9  ;;  %v358_v28 = vsel %vm32_vm0, %v314_v12, 0.0  ;;  %v366_v31 = vsel %vm32_vm0, %v315_v14, 0.0 }
  0x47   :  { %v1056_v32 = vadd.f32 %v286_v10, %v285_v61  ;;  %v335_v40 = vrot.slane %v334_v21, 2  ;;  %v343_v34 = vadd.f32 %v342_v23, %v341_v36  ;;  %v351_v46 = vrot.slane %v350_v26, 4 }
  0x48   :  { %v328_v37 = vrot.slane %v327_v2, 1  ;;  %v359_v38 = vadd.f32 %v358_v28, %v357_v44  ;;  %v367_v39 = vsel %vm32_vm0, %v316_v35, 0.0  ;;  %v375_v41 = vsel %vm32_vm0, %v317_v20, 0.0 }
  0x49   :  { %v336_v62 = vadd.f32 %v335_v40, %v334_v21  ;;  %v344_v42 = vrot.slane %v343_v34, 2  ;;  %v352_v43 = vadd.f32 %v351_v46, %v350_v26  ;;  %v368_v45 = vadd.f32 %v367_v39, %v366_v31 }
  0x4a   :  { %v329_v17 = vadd.f32 %v328_v37, %v327_v2  ;;  %v360_v48 = vrot.slane %v359_v38, 4  ;;  %v376_v49 = vsel %vm32_vm0, %v318_v33, 0.0  ;;  %v384_v51 = vsel %vm32_vm0, %v319_v57, 0.0 }
  0x4b   :  { %v337_v52 = vrot.slane %v336_v62, 1  ;;  %v345_v53 = vadd.f32 %v344_v42, %v343_v34  ;;  %v353_v54 = vrot.slane %v352_v43, 2  ;;  %v369_v55 = vrot.slane %v368_v45, 4 }
  0x4c   :  { %v361_v50 = vadd.f32 %v360_v48, %v359_v38  ;;  %v377_v58 = vadd.f32 %v376_v49, %v375_v41  ;;  %v385_v24 = vsel %vm32_vm0, %v320_v29, 0.0  ;;  %v393_v59 = vadd.f32 %v329_v17, %v1006_v11 }
  0x4d   :  { %vm456_vm2 = vcmask 1041409   ;;  %v338_v60 = vadd.f32 %v337_v52, %v336_v62  ;;  %v346_v61 = vrot.slane %v345_v53, 1  ;;  %v354_v63 = vadd.f32 %v353_v54, %v352_v43 }
  0x4e   :  { %v370_v1 = vadd.f32 %v369_v55, %v368_v45  ;;  %v362_v13 = vrot.slane %v361_v50, 2  ;;  %v378_v5 = vrot.slane %v377_v58, 4  ;;  %v386_v0 = vadd.f32 %v385_v24, %v384_v51 }
  0x4f   :  { %v401_v6 = vmul.f32 0.015625, %v393_v59  ;;  %vm458_vm3 = vcmask 1042434   ;;  %v347_v16 = vadd.f32 %v346_v61, %v345_v53  ;;  %v355_v9 = vrot.slane %v354_v63, 1 }
  0x50   :  { %v371_v10 = vrot.slane %v370_v1, 2  ;;  %v394_v12 = vadd.f32 %v338_v60, %v1014_v4  ;;  %v363_v14 = vadd.f32 %v362_v13, %v361_v50  ;;  %v379_v15 = vadd.f32 %v378_v5, %v377_v58 }
  0x51   :  { %v387_v36 = vrot.slane %v386_v0, 4  ;;  %v409_v56 = vpack.c.bf16 %v401_v6, %v401_v6  ;;  %vm460_vm4 = vcmask 1043459   ;;  %v356_v11 = vadd.f32 %v355_v9, %v354_v63 }
  0x52   :  { %v372_v8 = vadd.f32 %v371_v10, %v370_v1  ;;  %v395_v19 = vadd.f32 %v347_v16, %v1024_v3  ;;  %v402_v35 = vmul.f32 0.015625, %v394_v12  ;;  %v364_v20 = vrot.slane %v363_v14, 1 }
  0x53   :  { %v380_v21 = vrot.slane %v379_v15, 2  ;;  %v388_v23 = vadd.f32 %v387_v36, %v386_v0  ;;  %v448_v26 = vunpack.c.l.b16 %v409_v56  ;;  %v396_v2 = vadd.f32 %v356_v11, %v1027_v7  ;;  %v593_v0 = vld [vmem:[%s1103_s2] ss:$0 sm:$0xff] }
  0x54   :  { %v373_v44 = vrot.slane %v372_v8, 1  ;;  %v403_v28 = vmul.f32 0.015625, %v395_v19  ;;  %v410_v31 = vpack.c.bf16 %v402_v35, %v402_v35  ;;  %v296_v4 = vadd.f32 %v295_v27, %v1021_v47 }
  0x55   :  { %v365_v33 = vadd.f32 %v364_v20, %v363_v14  ;;  %v381_v57 = vadd.f32 %v380_v21, %v379_v15  ;;  %v389_v40 = vrot.slane %v388_v23, 2  ;;  %v404_v46 = vmul.f32 0.015625, %v396_v2 }
  0x56   :  { %v374_v34 = vadd.f32 %v373_v44, %v372_v8  ;;  %v411_v37 = vpack.c.bf16 %v403_v28, %v403_v28  ;;  %v449_v38 = vunpack.c.l.b16 %v410_v31  ;;  %v303_v3 = vadd.f32 %v1056_v32, %v979_v22 }
  0x57   :  { %v382_v39 = vrot.slane %v381_v57, 1  ;;  %v390_v41 = vadd.f32 %v389_v40, %v388_v23  ;;  %v397_v29 = vadd.f32 %v365_v33, %v1040_v25  ;;  %v412_v62 = vpack.c.bf16 %v404_v46, %v404_v46 }
  0x58   :  { %v398_v7 = vadd.f32 %v374_v34, %v1043_v18  ;;  %v450_v42 = vunpack.c.l.b16 %v411_v37  ;;  %v457_v47 = vsel %vm456_vm2, %v449_v38, %v448_v26  ;;  %v304_v27 = vadd.f32 %v296_v4, %v986_v30 }
  0x59   :  { %v383_v43 = vadd.f32 %v382_v39, %v381_v57  ;;  %v391_v45 = vrot.slane %v390_v41, 1  ;;  %v405_v17 = vmul.f32 0.015625, %v397_v29  ;;  %v451_v49 = vunpack.c.l.b16 %v412_v62 }
  0x5a   :  { %v406_v48 = vmul.f32 0.015625, %v398_v7  ;;  %v459_v51 = vsel %vm458_vm3, %v450_v42, %v457_v47  ;;  %vm462_vm5 = vcmask 1044484   ;;  %vm464_vm6 = vcmask 1045509  }
  0x5b   :  { %v392_v22 = vadd.f32 %v391_v45, %v390_v41  ;;  %v399_v32 = vadd.f32 %v383_v43, %v303_v3  ;;  %v413_v52 = vpack.c.bf16 %v405_v17, %v405_v17  ;;  %v461_v25 = vsel %vm460_vm4, %v451_v49, %v459_v51 }
  0x5c   :  { %v414_v53 = vpack.c.bf16 %v406_v48, %v406_v48  ;;  %vm466_vm7 = vcmask 1046534   ;;  %vm468_vm8 = vcmask 1047559  }
  0x5d   :  { %v400_v18 = vadd.f32 %v392_v22, %v304_v27  ;;  %v407_v54 = vmul.f32 0.015625, %v399_v32  ;;  %v452_v55 = vunpack.c.l.b16 %v413_v52 }
  0x5e   :  { %v453_v50 = vunpack.c.l.b16 %v414_v53 }
  0x5f   :  { %v408_v30 = vmul.f32 0.015625, %v400_v18  ;;  %v415_v58 = vpack.c.bf16 %v407_v54, %v407_v54  ;;  %v463_v24 = vsel %vm462_vm5, %v452_v55, %v461_v25 }
  0x60   :  { %v465_v59 = vsel %vm464_vm6, %v453_v50, %v463_v24 }
  0x61   :  { %v416_v60 = vpack.c.bf16 %v408_v30, %v408_v30  ;;  %v454_v61 = vunpack.c.l.b16 %v415_v58 }
  0x63   :  { %v455_v63 = vunpack.c.l.b16 %v416_v60  ;;  %v467_v1 = vsel %vm466_vm7, %v454_v61, %v465_v59 }
  0x65   :  { %v469_v13 = vsel %vm468_vm8, %v455_v63, %v467_v1 }
  0x66   :  { %v470_v5 = vpack.c.b16 %v469_v13, %v469_v13 }
  0x68   :  { %629 = vmatmul.mubr.msk.bf16.vlgmr.msra.gmra.mrb[0].mxu0 %vm32_vm0, %v470_v5 }
 0x13b   :  { %v572_v6 = vpop.f32.mrb[0].mxu0 }
 0x13c   :  { %v573_v16 = vadd.f32 %v593_v0, %v572_v6  ;;  %v630_v9 = vpop.f32.mrb[1].mxu0 }
 0x13d   :  { %v575_v10 = vpop.f32.mrb[2].mxu0 }
 0x13e   :  { %578 = vst [vmem:[#allocation2] sm:$0xff] %v573_v16  ;;  %v631_v12 = vpop.f32.mrb[3].mxu0 }
 0x13f   :  { %654 = shalt.err (!%p651_p4)
}
 0x140   :  { %s655_s2 = scalar_lea.hbm %s1104_s3, 128 }
 0x141   :  { %p656_p5 = scmp.ne.s32.totalorder %s1104_s3, %s655_s2  ;;  %p659_p6 = scmp.lt.u32.totalorder %s655_s2, %s1104_s3 }
 0x143   :  { %p661_p7 = pnand %p659_p6, %p656_p5 }
 0x145   :  { %664 = shalt.err (!%p661_p7)
}
 0x146   :  { %588 = dma.vmem_to_hbm [thread:$0]  %s586_s19, 128, %s1104_s3, [#allocation3]  }
 0x147   :  { %665 = dma.done.wait [#allocation3], 128  }
 0x148   :  { %666 = vsyncadd [#allocation3], 4294967168 }
 0x149   :  { %592 = vsyncpa [#allocation3], 1 }

</bundles_post_ra>
